<compile_context>
chip_gen: v6e
topology: v6e:2x2x1
jax: 0.10.0
libtpu: 0.0.40
codegen_flags: <defaults>
</compile_context>

<pallas_src>
import jax
import jax.numpy as jnp
from jax.experimental import pallas as pl
from jax.experimental.pallas import tpu as pltpu


def critic_kernel(xT_ref, w1t_ref, b1_ref, w2t_ref, b2_ref, w3_ref, b3_ref, o_ref):
    xT = xT_ref[...]          # (obs_dim, tm)  -- batch on lanes
    w1t = w1t_ref[...]        # (64, obs_dim)
    obs_dim = xT.shape[0]

    # --- layer 1: K = obs_dim unrolled as VPU broadcast FMAs (keeps the MXU off the path).
    acc = w1t[:, 0:1] * xT[0:1, :]
    for k in range(1, obs_dim):
        acc = acc + w1t[:, k:k + 1] * xT[k:k + 1, :]
    h1 = jnp.maximum(acc + b1_ref[...], 0.0)                                  # (64, tm)

    # --- layer 2: the only MXU matmul, (128, 64) @ (64, tm), f32 accumulation.
    h2 = jnp.dot(w2t_ref[...], h1, preferred_element_type=jnp.float32) + b2_ref[...]
    h2 = jnp.maximum(h2, 0.0)                                                 # (128, tm)

    # --- layer 3: N = 1 -> VPU multiply + sublane (XLU) reduce; lane-dense (1, tm) store.
    o_ref[...] = jnp.sum(h2 * w3_ref[...], axis=0, keepdims=True) + b3_ref[...]


def cartpole_critic_forward(x, params, tile=512):
    """x: (B, obs_dim) f32. Returns (B, 1) f32, matching the PyTorch forward."""
    w1, b1, w2, b2, w3, b3 = params            # w: (in, out), b: (1, out)
    B, obs_dim = x.shape
    h1_dim, h2_dim = w1.shape[1], w2.shape[1]

    # Batch tile: a multiple of 128 (lane width); zero-pad the batch to a whole number of tiles.
    tm = min(tile, ((B + 127) // 128) * 128)
    b_pad = ((B + tm - 1) // tm) * tm
    grid = (b_pad // tm,)

    # Cheap wrapper-side layout plumbing (tiny XLA ops): batch -> lanes, params transposed.
    xT = jnp.pad(x, ((0, b_pad - B), (0, 0))).T          # (obs_dim, b_pad)
    w1t = w1.T                                           # (64, obs_dim)
    b1c = b1.reshape(h1_dim, 1)                          # (64, 1)
    w2t = w2.T                                           # (128, 64)
    b2c = b2.reshape(h2_dim, 1)                          # (128, 1)
    w3c = w3.reshape(h2_dim, 1)                          # (128, 1)
    b3c = b3.reshape(1, 1)                               # (1, 1)

    out = pl.pallas_call(
        critic_kernel,
        out_shape=jax.ShapeDtypeStruct((1, b_pad), jnp.float32),
        grid=grid,
        in_specs=[
            pl.BlockSpec((obs_dim, tm), lambda i: (0, i)),        # x tile (batch on lanes)
            pl.BlockSpec((h1_dim, obs_dim), lambda i: (0, 0)),    # weights: constant index_maps
            pl.BlockSpec((h1_dim, 1), lambda i: (0, 0)),          #   -> DMA'd once, VMEM-resident
            pl.BlockSpec((h2_dim, h1_dim), lambda i: (0, 0)),
            pl.BlockSpec((h2_dim, 1), lambda i: (0, 0)),
            pl.BlockSpec((h2_dim, 1), lambda i: (0, 0)),
            pl.BlockSpec((1, 1), lambda i: (0, 0)),
        ],
        out_specs=pl.BlockSpec((1, tm), lambda i: (0, i)),        # lane-dense output tile
        compiler_params=pltpu.CompilerParams(
            dimension_semantics=("parallel",)),                   # shards across v7x's 2 TCs
    )(xT, w1t, b1c, w2t, b2c, w3c, b3c)

    return out[0, :B].reshape(B, 1)


def init_params(key, obs_dim):
    # Deterministic init mimicking nn.Linear's U(-1/sqrt(fan_in), 1/sqrt(fan_in)).
    def linear(key, fan_in, fan_out):
        kw, kb = jax.random.split(key)
        bound = 1.0 / jnp.sqrt(jnp.float32(fan_in))
        w = jax.random.uniform(kw, (fan_in, fan_out), jnp.float32, -bound, bound)
        b = jax.random.uniform(kb, (1, fan_out), jnp.float32, -bound, bound)
        return w, b

    k1, k2, k3 = jax.random.split(key, 3)
    w1, b1 = linear(k1, obs_dim, 64)
    w2, b2 = linear(k2, 64, 128)
    w3, b3 = linear(k3, 128, 1)
    return (w1, b1, w2, b2, w3, b3)


def reference_forward(x, params):
    w1, b1, w2, b2, w3, b3 = params
    h1 = jnp.maximum(x @ w1 + b1, 0.0)
    h2 = jnp.maximum(h1 @ w2 + b2, 0.0)
    return h2 @ w3 + b3


# TODO(synk): get_value / get_weights / get_grad / set_grad are host-side parameter plumbing
# for A3C workers (no tensor math) and are intentionally not part of the Pallas kernel.

if __name__ == "__main__":
    key = jax.random.PRNGKey(0)
    obs_dim = 4   # CartPole observation dimension
    batch = 2
    kx, kp, kx2 = jax.random.split(key, 3)
    params = init_params(kp, obs_dim)

    # Small online-inference style batch (matches CartpoleCritic.get_value usage).
    x = jax.random.normal(kx, (batch, obs_dim), dtype=jnp.float32)
    out = jax.block_until_ready(cartpole_critic_forward(x, params))
    ref = reference_forward(x, params)
    assert out.shape == (batch, 1)
    assert jnp.allclose(out, ref, atol=1e-5, rtol=1e-5)

    # Larger batch exercising multi-tile grid + zero-padding + parallel batch axis.
    x2 = jax.random.normal(kx2, (200, obs_dim), dtype=jnp.float32)
    out2 = jax.block_until_ready(cartpole_critic_forward(x2, params, tile=128))
    ref2 = reference_forward(x2, params)
    assert out2.shape == (200, 1)
    assert jnp.allclose(out2, ref2, atol=1e-5, rtol=1e-5)

    print("KERNEL_OK")
</pallas_src>

<mosaic_0001>
module attributes {stable_mosaic.version = 11 : i64} {
  func.func @critic_kernel(%arg0: i32, %arg1: memref<4x128xf32, #tpu.memory_space<vmem>>, %arg2: memref<64x4xf32, #tpu.memory_space<vmem>>, %arg3: memref<64x1xf32, #tpu.memory_space<vmem>>, %arg4: memref<128x64xf32, #tpu.memory_space<vmem>>, %arg5: memref<128x1xf32, #tpu.memory_space<vmem>>, %arg6: memref<128x1xf32, #tpu.memory_space<vmem>>, %arg7: memref<1x1xf32, #tpu.memory_space<vmem>>, %arg8: memref<1x128xf32, #tpu.memory_space<vmem>>) attributes {dimension_semantics = [#tpu.dimension_semantics<parallel>], iteration_bounds = array<i64: 1>, scalar_prefetch = 0 : i64, scratch_operands = 0 : i64, tpu.core_type = #tpu.core_type<tc>, window_params = [{transform_indices = @transform_0, window_bounds = array<i64: 4, 128>}, {pipeline_mode = #tpu.pipeline_mode<synchronous>, transform_indices = @transform_1, window_bounds = array<i64: 64, 4>}, {pipeline_mode = #tpu.pipeline_mode<synchronous>, transform_indices = @transform_2, window_bounds = array<i64: 64, 1>}, {pipeline_mode = #tpu.pipeline_mode<synchronous>, transform_indices = @transform_3, window_bounds = array<i64: 128, 64>}, {pipeline_mode = #tpu.pipeline_mode<synchronous>, transform_indices = @transform_4, window_bounds = array<i64: 128, 1>}, {pipeline_mode = #tpu.pipeline_mode<synchronous>, transform_indices = @transform_5, window_bounds = array<i64: 128, 1>}, {pipeline_mode = #tpu.pipeline_mode<synchronous>, transform_indices = @transform_6, window_bounds = array<i64: 1, 1>}, {transform_indices = @transform_7, window_bounds = array<i64: 1, 128>}]} {
    %c0 = arith.constant 0 : index
    %c0_0 = arith.constant 0 : index
    %0 = vector.load %arg1[%c0, %c0_0] : memref<4x128xf32, #tpu.memory_space<vmem>>, vector<4x128xf32>
    %c0_1 = arith.constant 0 : index
    %c0_2 = arith.constant 0 : index
    %1 = vector.load %arg2[%c0_1, %c0_2] : memref<64x4xf32, #tpu.memory_space<vmem>>, vector<64x4xf32>
    %2 = vector.extract_strided_slice %1 {offsets = [0, 0], sizes = [64, 1], strides = [1, 1]} : vector<64x4xf32> to vector<64x1xf32>
    %3 = vector.extract_strided_slice %0 {offsets = [0, 0], sizes = [1, 128], strides = [1, 1]} : vector<4x128xf32> to vector<1x128xf32>
    %4 = vector.broadcast %2 : vector<64x1xf32> to vector<64x128xf32>
    %5 = vector.broadcast %3 : vector<1x128xf32> to vector<64x128xf32>
    %6 = arith.mulf %4, %5 : vector<64x128xf32>
    %7 = vector.extract_strided_slice %1 {offsets = [0, 1], sizes = [64, 1], strides = [1, 1]} : vector<64x4xf32> to vector<64x1xf32>
    %8 = vector.extract_strided_slice %0 {offsets = [1, 0], sizes = [1, 128], strides = [1, 1]} : vector<4x128xf32> to vector<1x128xf32>
    %9 = vector.broadcast %7 : vector<64x1xf32> to vector<64x128xf32>
    %10 = vector.broadcast %8 : vector<1x128xf32> to vector<64x128xf32>
    %11 = arith.mulf %9, %10 : vector<64x128xf32>
    %12 = arith.addf %6, %11 : vector<64x128xf32>
    %13 = vector.extract_strided_slice %1 {offsets = [0, 2], sizes = [64, 1], strides = [1, 1]} : vector<64x4xf32> to vector<64x1xf32>
    %14 = vector.extract_strided_slice %0 {offsets = [2, 0], sizes = [1, 128], strides = [1, 1]} : vector<4x128xf32> to vector<1x128xf32>
    %15 = vector.broadcast %13 : vector<64x1xf32> to vector<64x128xf32>
    %16 = vector.broadcast %14 : vector<1x128xf32> to vector<64x128xf32>
    %17 = arith.mulf %15, %16 : vector<64x128xf32>
    %18 = arith.addf %12, %17 : vector<64x128xf32>
    %19 = vector.extract_strided_slice %1 {offsets = [0, 3], sizes = [64, 1], strides = [1, 1]} : vector<64x4xf32> to vector<64x1xf32>
    %20 = vector.extract_strided_slice %0 {offsets = [3, 0], sizes = [1, 128], strides = [1, 1]} : vector<4x128xf32> to vector<1x128xf32>
    %21 = vector.broadcast %19 : vector<64x1xf32> to vector<64x128xf32>
    %22 = vector.broadcast %20 : vector<1x128xf32> to vector<64x128xf32>
    %23 = arith.mulf %21, %22 : vector<64x128xf32>
    %24 = arith.addf %18, %23 : vector<64x128xf32>
    %c0_3 = arith.constant 0 : index
    %c0_4 = arith.constant 0 : index
    %25 = vector.load %arg3[%c0_3, %c0_4] : memref<64x1xf32, #tpu.memory_space<vmem>>, vector<64x1xf32>
    %26 = vector.broadcast %25 : vector<64x1xf32> to vector<64x128xf32>
    %27 = arith.addf %24, %26 : vector<64x128xf32>
    %cst = arith.constant 0.000000e+00 : f32
    %28 = vector.broadcast %cst : f32 to vector<64x128xf32>
    %29 = arith.maximumf %27, %28 : vector<64x128xf32>
    %c0_5 = arith.constant 0 : index
    %c0_6 = arith.constant 0 : index
    %30 = vector.load %arg4[%c0_5, %c0_6] : memref<128x64xf32, #tpu.memory_space<vmem>>, vector<128x64xf32>
    %cst_7 = arith.constant dense<0.000000e+00> : vector<128x128xf32>
    %31 = tpu.matmul %30, %29, %cst_7 {dimension_numbers = #tpu.dot_dimension_numbers<[1], [0], [0], [1], [0, 0, 1, 1], [], []>} : vector<128x64xf32>, vector<64x128xf32>, vector<128x128xf32> -> vector<128x128xf32>
    %c0_8 = arith.constant 0 : index
    %c0_9 = arith.constant 0 : index
    %32 = vector.load %arg5[%c0_8, %c0_9] : memref<128x1xf32, #tpu.memory_space<vmem>>, vector<128x1xf32>
    %33 = vector.broadcast %32 : vector<128x1xf32> to vector<128x128xf32>
    %34 = arith.addf %31, %33 : vector<128x128xf32>
    %cst_10 = arith.constant 0.000000e+00 : f32
    %35 = vector.broadcast %cst_10 : f32 to vector<128x128xf32>
    %36 = arith.maximumf %34, %35 : vector<128x128xf32>
    %c0_11 = arith.constant 0 : index
    %c0_12 = arith.constant 0 : index
    %37 = vector.load %arg6[%c0_11, %c0_12] : memref<128x1xf32, #tpu.memory_space<vmem>>, vector<128x1xf32>
    %38 = vector.broadcast %37 : vector<128x1xf32> to vector<128x128xf32>
    %39 = arith.mulf %36, %38 : vector<128x128xf32>
    %cst_13 = arith.constant dense<0.000000e+00> : vector<128xf32>
    %40 = vector.multi_reduction <add>, %39, %cst_13 [0] : vector<128x128xf32> to vector<128xf32>
    %41 = vector.shape_cast %40 : vector<128xf32> to vector<1x128xf32>
    %c0_14 = arith.constant 0 : index
    %c0_15 = arith.constant 0 : index
    %42 = vector.load %arg7[%c0_14, %c0_15] : memref<1x1xf32, #tpu.memory_space<vmem>>, vector<1x1xf32>
    %43 = vector.broadcast %42 : vector<1x1xf32> to vector<1x128xf32>
    %44 = arith.addf %41, %43 : vector<1x128xf32>
    %c0_16 = arith.constant 0 : index
    %c0_17 = arith.constant 0 : index
    %45 = vector.load %arg8[%c0_16, %c0_17] : memref<1x128xf32, #tpu.memory_space<vmem>>, vector<1x128xf32>
    tpu.vector_store %arg8[%c0_16, %c0_17], %44 {strides = array<i32>} : memref<1x128xf32, #tpu.memory_space<vmem>>, vector<1x128xf32>,
    return
  }
  func.func @transform_0(%arg0: i32) -> (i32, i32) {
    %c0_i32 = arith.constant 0 : i32
    %c0_i32_0 = arith.constant 0 : i32
    return %c0_i32, %arg0 : i32, i32
  }
  func.func @transform_1(%arg0: i32) -> (i32, i32) {
    %c0_i32 = arith.constant 0 : i32
    %c0_i32_0 = arith.constant 0 : i32
    %c0_i32_1 = arith.constant 0 : i32
    return %c0_i32, %c0_i32_0 : i32, i32
  }
  func.func @transform_2(%arg0: i32) -> (i32, i32) {
    %c0_i32 = arith.constant 0 : i32
    %c0_i32_0 = arith.constant 0 : i32
    %c0_i32_1 = arith.constant 0 : i32
    return %c0_i32, %c0_i32_0 : i32, i32
  }
  func.func @transform_3(%arg0: i32) -> (i32, i32) {
    %c0_i32 = arith.constant 0 : i32
    %c0_i32_0 = arith.constant 0 : i32
    %c0_i32_1 = arith.constant 0 : i32
    return %c0_i32, %c0_i32_0 : i32, i32
  }
  func.func @transform_4(%arg0: i32) -> (i32, i32) {
    %c0_i32 = arith.constant 0 : i32
    %c0_i32_0 = arith.constant 0 : i32
    %c0_i32_1 = arith.constant 0 : i32
    return %c0_i32, %c0_i32_0 : i32, i32
  }
  func.func @transform_5(%arg0: i32) -> (i32, i32) {
    %c0_i32 = arith.constant 0 : i32
    %c0_i32_0 = arith.constant 0 : i32
    %c0_i32_1 = arith.constant 0 : i32
    return %c0_i32, %c0_i32_0 : i32, i32
  }
  func.func @transform_6(%arg0: i32) -> (i32, i32) {
    %c0_i32 = arith.constant 0 : i32
    %c0_i32_0 = arith.constant 0 : i32
    %c0_i32_1 = arith.constant 0 : i32
    return %c0_i32, %c0_i32_0 : i32, i32
  }
  func.func @transform_7(%arg0: i32) -> (i32, i32) {
    %c0_i32 = arith.constant 0 : i32
    %c0_i32_0 = arith.constant 0 : i32
    return %c0_i32, %arg0 : i32, i32
  }
}

</mosaic_0001>

<bundles_post_ra>
// kernel: tpu_custom_call.1
= control target key start
LH: loop header
LB: loop body
LE: loop exit
PB: predicated region body
PF: predicated region fallthrough
CT: control target
= control target key end

     0   :  { %s1316_s0 = inlined_call_operand.vmem [shape: f32[4,128], index: 0, kind: input, shape index: {}]   ;;  %s1317_s1 = inlined_call_operand.vmem [shape: f32[64,4], index: 1, kind: input, shape index: {}]   ;;  %s1318_s2 = inlined_call_operand.vmem [shape: f32[64,1], index: 2, kind: input, shape index: {}]   ;;  %s1319_s3 = inlined_call_operand.vmem [shape: f32[128,64], index: 3, kind: input, shape index: {}]   ;;  %s1320_s4 = inlined_call_operand.vmem [shape: f32[128,1], index: 4, kind: input, shape index: {}]   ;;  %s1321_s5 = inlined_call_operand.vmem [shape: f32[128,1], index: 5, kind: input, shape index: {}]   ;;  %s1322_s6 = inlined_call_operand.<no memory space> [shape: f32[1,1], index: 6, kind: input, shape index: {}]   ;;  %s1323_s7 = inlined_call_operand.hbm [shape: f32[1,128], index: 7, kind: output, shape index: {}]  }
   0x1   :  { %v12_v0 = vstv %s1322_s6 }
   0x2   :  { %13 = vst [vmem:[#allocation2] sm:$0x1] %v12_v0 }
   0x3   :  { %v36_v1 = vld [vmem:[%s1317_s1 + $0x30] sm:$0xff]  ;;  %v35_v2 = vld [vmem:[%s1317_s1 + $0x28] sm:$0xff]  ;;  %v941_v3 = vmov 2   ;;  %v942_v4 = vmov 0   ;;  %v33_v5 = vld [vmem:[%s1317_s1 + $0x18] sm:$0xff]  ;;  %v943_v6 = vmov 1  }
   0x4   :  { %899 = vset.pattern.permute.xlu0 %v941_v3  ;;  %892 = vset.pattern.permute.xlu1 %v942_v4  ;;  %v37_v7 = vld [vmem:[%s1317_s1 + $0x38] sm:$0xff]  ;;  %v944_v8 = vmov 3  }
   0x5   :  { %70 = vperm.xlu1 %892, %v36_v1   ;;  %163 = vperm.xlu0 %899, %v35_v2  }
   0x9   :  { %893 = vset.pattern.permute.xlu1 %v943_v6  ;;  %155 = vperm.xlu0 %899, %v33_v5  }
   0xa   :  { %115 = vperm.xlu1 %893, %v36_v1  }
   0xd   :  { %906 = vset.pattern.permute.xlu0 %v944_v8 }
   0xe   :  { %894 = vset.pattern.permute.xlu1 %v941_v3  ;;  %223 = vperm.xlu0 %906, %v37_v7  }
   0xf   :  { %171 = vperm.xlu1 %894, %v37_v7  }
  0x10   :  { %14 = vsyncpa [#allocation4], 0  ;;  %v34_v9 = vld [vmem:[%s1317_s1 + $0x20] sm:$0xff]  ;;  %v253_v11 = vld [vmem:[%s1318_s2 + $0x38] sm:$0xff]  ;;  %vm422_vm0 = vcmask 523264   ;;  %v78_v53 = vlaneseq }
  0x11   :  { %v1015_v10 = vld [vmem:[%s1317_s1] sm:$0xff]  ;;  %v1029_v12 = vld [vmem:[%s1317_s1 + $0x8] sm:$0xff]  ;;  %v249_v14 = vld [vmem:[%s1318_s2 + $0x18] sm:$0xff] }
  0x12   :  { %207 = vperm.xlu0 %906, %v33_v5   ;;  %v250_v13 = vld [vmem:[%s1318_s2 + $0x20] sm:$0xff]  ;;  %v32_v15 = vld [vmem:[%s1317_s1 + $0x10] sm:$0xff]  ;;  %v327_v18 = vld [vmem:[%s1320_s4 + $0x8] sm:$0xff]  ;;  %v1163_v57 = vshrl.u32 %v78_v53, 7 }
  0x13   :  { %895 = vset.pattern.permute.xlu1 %v943_v6  ;;  %v248_v16 = vld [vmem:[%s1318_s2 + $0x10] sm:$0xff]  ;;  %v246_v17 = vld [vmem:[%s1318_s2] sm:$0xff]  ;;  %v329_v19 = vld [vmem:[%s1320_s4 + $0x18] sm:$0xff] }
  0x14   :  { %111 = vperm.xlu1 %895, %v35_v2   ;;  %v252_v20 = vld [vmem:[%s1318_s2 + $0x30] sm:$0xff]  ;;  %v331_v21 = vld [vmem:[%s1320_s4 + $0x28] sm:$0xff]  ;;  %v635_v23 = vld [vmem:[%s1321_s5 + $0x18] sm:$0xff]  ;;  %v124_v59 = vsub.s32 1, %v1163_v57  ;;  %v80_v62 = vsub.s32 0, %v1163_v57  ;;  %v176_v63 = vsub.s32 2, %v1163_v57 }
  0x15   :  { %v633_v22 = vld [vmem:[%s1321_s5 + $0x8] sm:$0xff]  ;;  %v636_v24 = vld [vmem:[%s1321_s5 + $0x20] sm:$0xff]  ;;  %v638_v27 = vld [vmem:[%s1321_s5 + $0x30] sm:$0xff]  ;;  %v228_v0 = vsub.s32 3, %v1163_v57 }
  0x16   :  { %911 = vset.pattern.permute.xlu0 %v943_v6  ;;  %v251_v25 = vld [vmem:[%s1318_s2 + $0x28] sm:$0xff]  ;;  %v639_v28 = vld [vmem:[%s1321_s5 + $0x38] sm:$0xff]  ;;  %v640_v29 = vld [vmem:[%s1321_s5 + $0x40] sm:$0xff] }
  0x17   :  { %119 = vperm.xlu0 %911, %v37_v7   ;;  %v637_v26 = vld [vmem:[%s1321_s5 + $0x28] sm:$0xff]  ;;  %v642_v31 = vld [vmem:[%s1321_s5 + $0x50] sm:$0xff]  ;;  %v643_v32 = vld [vmem:[%s1321_s5 + $0x58] sm:$0xff] }
  0x18   :  { %896 = vset.pattern.permute.xlu1 %v941_v3  ;;  %v641_v30 = vld [vmem:[%s1321_s5 + $0x48] sm:$0xff]  ;;  %v644_v33 = vld [vmem:[%s1321_s5 + $0x60] sm:$0xff]  ;;  %v647_v37 = vld [vmem:[%s1321_s5 + $0x78] sm:$0xff] }
  0x19   :  { %167 = vperm.xlu1 %896, %v36_v1   ;;  %v247_v34 = vld [vmem:[%s1318_s2 + $0x8] sm:$0xff]  ;;  %v326_v36 = vld [vmem:[%s1320_s4] sm:$0xff]  ;;  %v328_v42 = vld [vmem:[%s1320_s4 + $0x10] sm:$0xff] }
  0x1a   :  { %v645_v35 = vld [vmem:[%s1321_s5 + $0x68] sm:$0xff]  ;;  %v310_v38 = vld [vmem:[%s1319_s3] sm:$0xff]  ;;  %v634_v49 = vld [vmem:[%s1321_s5 + $0x10] sm:$0xff] }
  0x1b   :  { %103 = vperm.xlu0 %911, %v33_v5   ;;  %v318_v39 = vld [vmem:[%s1319_s3 + $0x40] sm:$0xff]  ;;  %847 = vmatprep.mubr.msk.f32.mxu0 %vm422_vm0, %v310_v38  ;;  %v332_v52 = vld [vmem:[%s1320_s4 + $0x30] sm:$0xff]  ;;  %v333_v56 = vld [vmem:[%s1320_s4 + $0x38] sm:$0xff] }
  0x1c   :  { %859 = vmatprep.mubr.msk.f32.mxu1 %vm422_vm0, %v318_v39  ;;  %v330_v44 = vld [vmem:[%s1320_s4 + $0x20] sm:$0xff]  ;;  %v646_v39 = vld [vmem:[%s1321_s5 + $0x70] sm:$0xff] }
  0x1d   :  { %897 = vset.pattern.permute.xlu1 %v942_v4  ;;  %v632_v46 = vld [vmem:[%s1321_s5] sm:$0xff] }
  0x1e   :  { %60 = vperm.xlu1 %897, %v34_v9   ;;  %v334_v60 = vld [vmem:[%s1320_s4 + $0x40] sm:$0xff] }
  0x1f   :  { %91 = vperm.xlu0 %911, %v1015_v10  }
  0x22   :  { %898 = vset.pattern.permute.xlu1 %v943_v6 }
  0x23   :  { %107 = vperm.xlu1 %898, %v34_v9   ;;  %913 = vset.pattern.permute.xlu0 %v942_v4 }
  0x24   :  { %75 = vperm.xlu0 %913, %v37_v7  }
  0x27   :  { %900 = vset.pattern.permute.xlu1 %v944_v8 }
  0x28   :  { %219 = vperm.xlu1 %900, %v36_v1   ;;  %65 = vperm.xlu0 %913, %v35_v2  }
  0x2c   :  { %901 = vset.pattern.permute.xlu1 %v942_v4  ;;  %291 = vperm.xlu0 %913, %v253_v11  }
  0x2d   :  { %55 = vperm.xlu1 %901, %v33_v5  }
  0x30   :  { %45 = vperm.xlu0 %913, %v1029_v12  }
  0x31   :  { %902 = vset.pattern.permute.xlu1 %v941_v3 }
  0x32   :  { %159 = vperm.xlu1 %902, %v34_v9  }
  0x34   :  { %276 = vperm.xlu0 %913, %v250_v13  }
  0x36   :  { %903 = vset.pattern.permute.xlu1 %v944_v8 }
  0x37   :  { %215 = vperm.xlu1 %903, %v35_v2   ;;  %v29_v2 = vld [vmem:[%s1316_s0] sm:$0xf] }
  0x38   :  { %271 = vperm.xlu0 %913, %v249_v14   ;;  %v1186_v5 = vrot.slane %v29_v2, %v80_v62  ;;  %v1190_v7 = vrot.slane %v29_v2, %v228_v0 }
  0x3b   :  { %904 = vset.pattern.permute.xlu1 %v942_v4 }
  0x3c   :  { %50 = vperm.xlu1 %904, %v32_v15   ;;  %266 = vperm.xlu0 %913, %v248_v16  }
  0x40   :  { %905 = vset.pattern.permute.xlu1 %v943_v6  ;;  %256 = vperm.xlu0 %913, %v246_v17  }
  0x41   :  { %99 = vperm.xlu1 %905, %v32_v15  }
  0x44   :  { %349 = vperm.xlu0 %913, %v327_v18  }
  0x45   :  { %907 = vset.pattern.permute.xlu1 %v944_v8 }
  0x46   :  { %211 = vperm.xlu1 %907, %v34_v9  }
  0x48   :  { %359 = vperm.xlu0 %913, %v329_v19   ;;  %v337_v19 = vld [vmem:[%s1320_s4 + $0x58] sm:$0xff] }
  0x4a   :  { %908 = vset.pattern.permute.xlu1 %v942_v4 }
  0x4b   :  { %286 = vperm.xlu1 %908, %v252_v20  }
  0x4c   :  { %369 = vperm.xlu0 %913, %v331_v21  }
  0x4f   :  { %909 = vset.pattern.permute.xlu1 %v943_v6  ;;  %v1188_v6 = vrot.slane %v29_v2, %v176_v63 }
  0x50   :  { %95 = vperm.xlu1 %909, %v1029_v12   ;;  %655 = vperm.xlu0 %913, %v633_v22  }
  0x54   :  { %910 = vset.pattern.permute.xlu1 %v941_v3  ;;  %665 = vperm.xlu0 %913, %v635_v23  }
  0x55   :  { %151 = vperm.xlu1 %910, %v32_v15  }
  0x58   :  { %670 = vperm.xlu0 %913, %v636_v24  }
  0x59   :  { %912 = vset.pattern.permute.xlu1 %v942_v4 }
  0x5a   :  { %281 = vperm.xlu1 %912, %v251_v25   ;;  %v338_v25 = vld [vmem:[%s1320_s4 + $0x60] sm:$0xff] }
  0x5c   :  { %675 = vperm.xlu0 %913, %v637_v26  }
  0x5e   :  { %40 = vperm.xlu1 %912, %v1015_v10  }
  0x60   :  { %680 = vperm.xlu0 %913, %v638_v27  }
  0x62   :  { %914 = vset.pattern.permute.xlu1 %v941_v3 }
  0x63   :  { %147 = vperm.xlu1 %914, %v1029_v12  }
  0x64   :  { %685 = vperm.xlu0 %913, %v639_v28  }
  0x67   :  { %915 = vset.pattern.permute.xlu1 %v944_v8 }
  0x68   :  { %690 = vperm.xlu0 %913, %v640_v29   ;;  %203 = vperm.xlu1 %915, %v32_v15  }
  0x6c   :  { %695 = vperm.xlu0 %913, %v641_v30   ;;  %916 = vset.pattern.permute.xlu1 %v941_v3  ;;  %v1179_v3 = vrot.slane %v29_v2, %v124_v59 }
  0x6d   :  { %143 = vperm.xlu1 %916, %v1015_v10  }
  0x70   :  { %700 = vperm.xlu0 %913, %v642_v31   ;;  %v339_v31 = vld [vmem:[%s1320_s4 + $0x68] sm:$0xff] }
  0x71   :  { %917 = vset.pattern.permute.xlu1 %v944_v8 }
  0x72   :  { %199 = vperm.xlu1 %917, %v1029_v12   ;;  %v336_v12 = vld [vmem:[%s1320_s4 + $0x50] sm:$0xff] }
  0x74   :  { %705 = vperm.xlu0 %913, %v643_v32  }
  0x76   :  { %195 = vperm.xlu1 %917, %v1015_v10  }
  0x78   :  { %710 = vperm.xlu0 %913, %v644_v33  }
  0x7a   :  { %918 = vset.pattern.permute.xlu1 %v942_v4  ;;  %v335_v4 = vld [vmem:[%s1320_s4 + $0x48] sm:$0xff] }
  0x7b   :  { %261 = vperm.xlu1 %918, %v247_v34  }
  0x7c   :  { %715 = vperm.xlu0 %913, %v645_v35   ;;  %v340_v35 = vld [vmem:[%s1320_s4 + $0x70] sm:$0xff] }
  0x7f   :  { %344 = vperm.xlu1 %918, %v326_v36  }
  0x80   :  { %v1135_v40 = vpop.permute.xlu1 %70  ;;  %725 = vperm.xlu0 %913, %v647_v37   ;;  %v1137_v41 = vpop.permute.xlu0 %163  ;;  %v341_v37 = vld [vmem:[%s1320_s4 + $0x78] sm:$0xff] }
  0x81   :  { %v183_v2 = vmul.f32 %v1188_v6, %v1137_v41 }
  0x83   :  { %354 = vperm.xlu1 %918, %v328_v42  }
  0x84   :  { %v156_v43 = vpop.permute.xlu0 %155 }
  0x85   :  { %v1145_v45 = vpop.permute.xlu1 %115  ;;  %v181_v26 = vmul.f32 %v1188_v6, %v156_v43  ;;  %v765_v43 = vld [vmem:[#allocation2] sm:$0x1] }
  0x87   :  { %364 = vperm.xlu1 %918, %v330_v44   ;;  %v132_v44 = vmul.f32 %v1179_v3, %v1145_v45 }
  0x89   :  { %v224_v47 = vpop.permute.xlu0 %223 }
  0x8a   :  { %v172_v48 = vpop.permute.xlu1 %171  ;;  %v237_v14 = vmul.f32 %v1190_v7, %v224_v47 }
  0x8b   :  { %650 = vperm.xlu1 %918, %v632_v46   ;;  %v185_v13 = vmul.f32 %v1188_v6, %v172_v48  ;;  %v88_v46 = vmul.f32 %v1186_v5, %v1135_v40 }
  0x8d   :  { %v208_v50 = vpop.permute.xlu0 %207  ;;  %v140_v48 = vadd.f32 %v132_v44, %v88_v46 }
  0x8e   :  { %v233_v29 = vmul.f32 %v1190_v7, %v208_v50 }
  0x8f   :  { %v1153_v51 = vpop.permute.xlu1 %111  ;;  %660 = vperm.xlu1 %918, %v634_v49  }
  0x90   :  { %v131_v40 = vmul.f32 %v1179_v3, %v1153_v51 }
  0x92   :  { %v120_v54 = vpop.permute.xlu0 %119 }
  0x93   :  { %374 = vperm.xlu1 %918, %v332_v52   ;;  %v133_v8 = vmul.f32 %v1179_v3, %v120_v54 }
  0x94   :  { %v1158_v55 = vpop.permute.xlu1 %167 }
  0x95   :  { %v184_v47 = vmul.f32 %v1188_v6, %v1158_v55 }
  0x96   :  { %v104_v58 = vpop.permute.xlu0 %103 }
  0x97   :  { %379 = vperm.xlu1 %918, %v333_v56   ;;  %v129_v21 = vmul.f32 %v1179_v3, %v104_v58  ;;  %v192_v52 = vadd.f32 %v184_v47, %v140_v48 }
  0x99   :  { %v1169_v61 = vpop.permute.xlu1 %60 }
  0x9a   :  { %v1174_v1 = vpop.permute.xlu0 %91  ;;  %v86_v55 = vmul.f32 %v1186_v5, %v1169_v61 }
  0x9b   :  { %384 = vperm.xlu1 %918, %v334_v60  }
  0x9e   :  { %v108_v9 = vpop.permute.xlu1 %107 }
  0x9f   :  { %v76_v10 = vpop.permute.xlu0 %75  ;;  %389 = vperm.xlu1 %918, %v335_v4   ;;  %v130_v60 = vmul.f32 %v1179_v3, %v108_v9 }
  0xa0   :  { %v89_v11 = vmul.f32 %v1186_v5, %v76_v10 }
  0xa1   :  { %v138_v4 = vadd.f32 %v130_v60, %v86_v55  ;;  %v321_v55 = vld [vmem:[%s1319_s3 + $0x58] sm:$0xff] }
  0xa2   :  { %v141_v15 = vadd.f32 %v133_v8, %v89_v11 }
  0xa3   :  { %v220_v16 = vpop.permute.xlu1 %219  ;;  %v66_v17 = vpop.permute.xlu0 %65  ;;  %394 = vperm.xlu1 %918, %v336_v12  }
  0xa4   :  { %v193_v18 = vadd.f32 %v185_v13, %v141_v15  ;;  %v236_v49 = vmul.f32 %v1190_v7, %v220_v16  ;;  %v87_v45 = vmul.f32 %v1186_v5, %v66_v17 }
  0xa6   :  { %v245_v20 = vadd.f32 %v237_v14, %v193_v18  ;;  %v244_v53 = vadd.f32 %v236_v49, %v192_v52  ;;  %v139_v8 = vadd.f32 %v131_v40, %v87_v45  ;;  %v312_v45 = vld [vmem:[%s1319_s3 + $0x10] sm:$0xff]  ;;  %v313_v40 = vld [vmem:[%s1319_s3 + $0x18] sm:$0xff] }
  0xa7   :  { %v292_v22 = vpop.permute.xlu0 %291  ;;  %399 = vperm.xlu1 %918, %v337_v19  }
  0xa8   :  { %v301_v23 = vadd.f32 %v292_v22, %v245_v20  ;;  %v56_v24 = vpop.permute.xlu1 %55  ;;  %v191_v14 = vadd.f32 %v183_v2, %v139_v8  ;;  %v322_v2 = vld [vmem:[%s1319_s3 + $0x60] sm:$0xff]  ;;  %v323_v8 = vld [vmem:[%s1319_s3 + $0x68] sm:$0xff] }
  0xa9   :  { %v85_v27 = vmul.f32 %v1186_v5, %v56_v24 }
  0xaa   :  { %v309_v28 = vmax.f32 %v301_v23, 0.0 }
  0xab   :  { %v137_v30 = vadd.f32 %v129_v21, %v85_v27  ;;  %404 = vperm.xlu1 %918, %v338_v25   ;;  %v46_v58 = vpop.permute.xlu0 %45 }
  0xac   :  { %831 = vmatprep.subr.mxu0 %v309_v28  ;;  %871 = vmatprep.subr.mxu1 %v309_v28 }
  0xad   :  { %v160_v32 = vpop.permute.xlu1 %159  ;;  %832 = vmatpush3.msra.mxu0 %v309_v28  ;;  %879 = vmatpush3.msra.mxu1 %v309_v28  ;;  %v189_v33 = vadd.f32 %v181_v26, %v137_v30 }
  0xae   :  { %v182_v0 = vmul.f32 %v1188_v6, %v160_v32 }
  0xaf   :  { %409 = vperm.xlu1 %918, %v339_v31   ;;  %v241_v34 = vadd.f32 %v233_v29, %v189_v33  ;;  %v277_v10 = vpop.permute.xlu0 %276 }
  0xb0   :  { %v190_v11 = vadd.f32 %v182_v0, %v138_v4  ;;  %v314_v0 = vld [vmem:[%s1319_s3 + $0x20] sm:$0xff]  ;;  %v315_v4 = vld [vmem:[%s1319_s3 + $0x28] sm:$0xff] }
  0xb2   :  { %v216_v36 = vpop.permute.xlu1 %215 }
  0xb3   :  { %414 = vperm.xlu1 %918, %v340_v35   ;;  %v235_v12 = vmul.f32 %v1190_v7, %v216_v36  ;;  %v272_v61 = vpop.permute.xlu0 %271 }
  0xb4   :  { %v297_v19 = vadd.f32 %v272_v61, %v241_v34 }
  0xb5   :  { %v243_v15 = vadd.f32 %v235_v12, %v191_v14  ;;  %v325_v12 = vld [vmem:[%s1319_s3 + $0x78] sm:$0xff] }
  0xb6   :  { %v305_v22 = vmax.f32 %v297_v19, 0.0 }
  0xb7   :  { %v1218_v38 = vpop.permute.xlu1 %50  ;;  %419 = vperm.xlu1 %918, %v341_v37   ;;  %v267_v32 = vpop.permute.xlu0 %266  ;;  %v83_v37 = vmul.f32 %v1186_v5, %v46_v58 }
  0xb8   :  { %v84_v25 = vmul.f32 %v1186_v5, %v1218_v38 }
  0xbb   :  { %720 = vperm.xlu1 %918, %v646_v39  }
  0xbc   :  { %v100_v42 = vpop.permute.xlu1 %99 }
  0xbd   :  { %v128_v23 = vmul.f32 %v1179_v3, %v100_v42  ;;  %v126_v42 = vmul.f32 %v1179_v3, %v1174_v1 }
  0xbf   :  { %768 = vperm.xlu1 %918, %v765_v43   ;;  %v136_v27 = vadd.f32 %v128_v23, %v84_v25 }
  0xc1   :  { %v212_v50 = vpop.permute.xlu1 %211 }
  0xc2   :  { %v234_v9 = vmul.f32 %v1190_v7, %v212_v50 }
  0xc4   :  { %v242_v51 = vadd.f32 %v234_v9, %v190_v11  ;;  %v316_v9 = vld [vmem:[%s1319_s3 + $0x30] sm:$0xff]  ;;  %v317_v11 = vld [vmem:[%s1319_s3 + $0x38] sm:$0xff] }
  0xc6   :  { %v287_v54 = vpop.permute.xlu1 %286  ;;  %v298_v17 = vadd.f32 %v277_v10, %v242_v51  ;;  %v324_v10 = vld [vmem:[%s1319_s3 + $0x70] sm:$0xff] }
  0xc7   :  { %v300_v56 = vadd.f32 %v287_v54, %v244_v53 }
  0xc8   :  { %v306_v41 = vmax.f32 %v298_v17, 0.0 }
  0xc9   :  { %v308_v59 = vmax.f32 %v300_v56, 0.0  ;;  %v257_v56 = vpop.permute.xlu0 %256 }
  0xcb   :  { %v96_v63 = vpop.permute.xlu1 %95  ;;  %833 = vmatprep.subr.mxu0 %v308_v59  ;;  %872 = vmatprep.subr.mxu1 %v308_v59 }
  0xcc   :  { %834 = vmatpush3.msra.mxu0 %v308_v59  ;;  %880 = vmatpush3.msra.mxu1 %v308_v59  ;;  %v127_v38 = vmul.f32 %v1179_v3, %v96_v63  ;;  %v320_v63 = vld [vmem:[%s1319_s3 + $0x50] sm:$0xff] }
  0xcd   :  { %v350_v51 = vpop.permute.xlu0 %349 }
  0xce   :  { %v135_v47 = vadd.f32 %v127_v38, %v83_v37 }
  0xd0   :  { %v152_v13 = vpop.permute.xlu1 %151 }
  0xd1   :  { %v180_v26 = vmul.f32 %v1188_v6, %v152_v13 }
  0xd3   :  { %v188_v29 = vadd.f32 %v180_v26, %v136_v27 }
  0xd5   :  { %v282_v16 = vpop.permute.xlu1 %281 }
  0xd6   :  { %v299_v18 = vadd.f32 %v282_v16, %v243_v15  ;;  %v360_v15 = vpop.permute.xlu0 %359 }
  0xd8   :  { %v307_v20 = vmax.f32 %v299_v18, 0.0 }
  0xd9   :  { %v41_v21 = vpop.permute.xlu1 %40 }
  0xda   :  { %835 = vmatprep.subr.mxu0 %v307_v20  ;;  %873 = vmatprep.subr.mxu1 %v307_v20  ;;  %v82_v36 = vmul.f32 %v1186_v5, %v41_v21  ;;  %v370_v16 = vpop.permute.xlu0 %369 }
  0xdb   :  { %836 = vmatpush3.msra.mxu0 %v307_v20  ;;  %881 = vmatpush3.msra.mxu1 %v307_v20 }
  0xdc   :  { %837 = vmatprep.subr.mxu0 %v306_v41  ;;  %874 = vmatprep.subr.mxu1 %v306_v41  ;;  %v134_v46 = vadd.f32 %v126_v42, %v82_v36 }
  0xdd   :  { %838 = vmatpush3.msra.mxu0 %v306_v41  ;;  %882 = vmatpush3.msra.mxu1 %v306_v41 }
  0xde   :  { %v148_v24 = vpop.permute.xlu1 %147  ;;  %839 = vmatprep.subr.mxu0 %v305_v22  ;;  %875 = vmatprep.subr.mxu1 %v305_v22  ;;  %v656_v18 = vpop.permute.xlu0 %655 }
  0xdf   :  { %840 = vmatpush3.msra.mxu0 %v305_v22  ;;  %883 = vmatpush3.msra.mxu1 %v305_v22  ;;  %v179_v44 = vmul.f32 %v1188_v6, %v148_v24 }
  0xe1   :  { %v187_v52 = vadd.f32 %v179_v44, %v135_v47 }
  0xe2   :  { %v666_v20 = vpop.permute.xlu0 %665 }
  0xe3   :  { %v204_v28 = vpop.permute.xlu1 %203 }
  0xe4   :  { %v232_v30 = vmul.f32 %v1190_v7, %v204_v28 }
  0xe6   :  { %v240_v31 = vadd.f32 %v232_v30, %v188_v29  ;;  %v671_v41 = vpop.permute.xlu0 %670 }
  0xe8   :  { %v296_v33 = vadd.f32 %v267_v32, %v240_v31  ;;  %v144_v34 = vpop.permute.xlu1 %143 }
  0xe9   :  { %v178_v43 = vmul.f32 %v1188_v6, %v144_v34  ;;  %v311_v6 = vld [vmem:[%s1319_s3 + $0x8] sm:$0xff] }
  0xea   :  { %v304_v35 = vmax.f32 %v296_v33, 0.0  ;;  %v676_v23 = vpop.permute.xlu0 %675 }
  0xeb   :  { %v186_v50 = vadd.f32 %v178_v43, %v134_v46 }
  0xec   :  { %841 = vmatprep.subr.mxu0 %v304_v35  ;;  %876 = vmatprep.subr.mxu1 %v304_v35 }
  0xed   :  { %v200_v39 = vpop.permute.xlu1 %199  ;;  %842 = vmatpush3.msra.mxu0 %v304_v35  ;;  %884 = vmatpush3.msra.mxu1 %v304_v35 }
  0xee   :  { %v231_v48 = vmul.f32 %v1190_v7, %v200_v39  ;;  %v681_v25 = vpop.permute.xlu0 %680 }
  0xf0   :  { %v239_v54 = vadd.f32 %v231_v48, %v187_v52 }
  0xf1   :  { %v196_v49 = vpop.permute.xlu1 %195 }
  0xf2   :  { %v230_v5 = vmul.f32 %v1190_v7, %v196_v49  ;;  %v319_v7 = vld [vmem:[%s1319_s3 + $0x48] sm:$0xff]  ;;  %v686_v27 = vpop.permute.xlu0 %685  ;;  %s945_s3 = smov [#allocation3]  }
  0xf3   :  { %s783_s25 = sshll.u32 %s945_s3, 4  ;;  %s784_s25 = int_to_ptr.vmem [resolvable:$true] %s783_s25 }
  0xf4   :  { %v238_v53 = vadd.f32 %v230_v5, %v186_v50  ;;  %s919_s4 = scalar_lea.vmem %s784_s25, 16  ;;  %s923_s5 = scalar_lea.vmem %s784_s25, 32 }
  0xf5   :  { %p920_p0 = scmp.ne.s32.totalorder %s784_s25, %s919_s4  ;;  %p924_p1 = scmp.lt.s32.totalorder %s784_s25, %s784_s25 }
  0xf6   :  { %v262_v58 = vpop.permute.xlu1 %261  ;;  %v294_v59 = vadd.f32 %v257_v56, %v238_v53  ;;  %v691_v29 = vpop.permute.xlu0 %690  ;;  %p925_p2 = scmp.lt.s32.totalorder %s923_s5, %s919_s4 }
  0xf7   :  { %v295_v60 = vadd.f32 %v262_v58, %v239_v54 }
  0xf8   :  { %v302_v3 = vmax.f32 %v294_v59, 0.0  ;;  %p926_p3 = por %p925_p2, %p924_p1 }
  0xf9   :  { %v303_v1 = vmax.f32 %v295_v60, 0.0 }
  0xfa   :  { %v345_v13 = vpop.permute.xlu1 %344  ;;  %v696_v39 = vpop.permute.xlu0 %695  ;;  %p927_p4 = pnand %p926_p3, %p920_p0 }
  0xfb   :  { %843 = vmatprep.subr.mxu0 %v303_v1  ;;  %877 = vmatprep.subr.mxu1 %v303_v1 }
  0xfc   :  { %844 = vmatpush3.msra.mxu0 %v303_v1  ;;  %885 = vmatpush3.msra.mxu1 %v303_v1 }
  0xfd   :  { %845 = vmatprep.subr.mxu0 %v302_v3  ;;  %878 = vmatprep.subr.mxu1 %v302_v3 }
  0xfe   :  { %846 = vmatpush3.msra.mxu0 %v302_v3  ;;  %886 = vmatpush3.msra.mxu1 %v302_v3  ;;  %v355_v14 = vpop.permute.xlu1 %354  ;;  %v701_v59 = vpop.permute.xlu0 %700 }
  0xff   :  { %848 = vmatmul.mubr.msk.f32.vlgmr.msra.gmra.mxu0 %vm422_vm0, %v311_v6  ;;  %860 = vmatmul.mubr.msk.f32.vlgmr.msra.gmra.mxu1 %vm422_vm0, %v319_v7 }
 0x100   :  { %850 = vmatprep.mubr.msk.f32.mxu0 %vm422_vm0, %v312_v45  ;;  %862 = vmatprep.mubr.msk.f32.mxu1 %vm422_vm0, %v320_v63 }
 0x102   :  { %v365_v61 = vpop.permute.xlu1 %364 }
 0x103   :  { %851 = vmatmul.mubr.msk.f32.gmra.mxu0 %vm422_vm0, %v313_v40  ;;  %863 = vmatmul.mubr.msk.f32.gmra.mxu1 %vm422_vm0, %v321_v55 }
 0x104   :  { %853 = vmatprep.mubr.msk.f32.mxu0 %vm422_vm0, %v314_v0  ;;  %865 = vmatprep.mubr.msk.f32.mxu1 %vm422_vm0, %v322_v2 }
 0x106   :  { %v651_v17 = vpop.permute.xlu1 %650 }
 0x107   :  { %854 = vmatmul.mubr.msk.f32.gmra.mxu0 %vm422_vm0, %v315_v4  ;;  %866 = vmatmul.mubr.msk.f32.gmra.mxu1 %vm422_vm0, %v323_v8 }
 0x108   :  { %856 = vmatprep.mubr.msk.f32.mxu0 %vm422_vm0, %v316_v9  ;;  %868 = vmatprep.mubr.msk.f32.mxu1 %vm422_vm0, %v324_v10 }
 0x10a   :  { %v661_v19 = vpop.permute.xlu1 %660 }
 0x10b   :  { %857 = vmatmul.mubr.msk.f32.gmra.mxu0 %vm422_vm0, %v317_v11  ;;  %869 = vmatmul.mubr.msk.f32.gmra.mxu1 %vm422_vm0, %v325_v12 }
 0x10e   :  { %v375_v21 = vpop.permute.xlu1 %374 }
 0x112   :  { %v380_v22 = vpop.permute.xlu1 %379 }
 0x116   :  { %v385_v24 = vpop.permute.xlu1 %384 }
 0x11a   :  { %v390_v26 = vpop.permute.xlu1 %389 }
 0x11e   :  { %v395_v28 = vpop.permute.xlu1 %394 }
 0x122   :  { %v400_v35 = vpop.permute.xlu1 %399 }
 0x126   :  { %v405_v56 = vpop.permute.xlu1 %404 }
 0x12a   :  { %v410_v11 = vpop.permute.xlu1 %409 }
 0x1bf   :  { %v849_v30 = vpop.f32.mrf.mxu0  ;;  %v861_v31 = vpop.f32.mrf.mxu1 }
 0x1c0   :  { %v543_v32 = vadd.f32 %v849_v30, %v350_v51  ;;  %v583_v12 = vadd.f32 %v861_v31, %v390_v26 }
 0x1c1   :  { %v537_v33 = vpop.f32.mrf.mxu0  ;;  %v577_v34 = vpop.f32.mrf.mxu1 }
 0x1c2   :  { %v538_v36 = vadd.f32 %v537_v33, %v345_v13  ;;  %v617_v42 = vmax.f32 %v543_v32, 0.0  ;;  %v578_v4 = vadd.f32 %v577_v34, %v385_v24  ;;  %v625_v32 = vmax.f32 %v583_v12, 0.0 }
 0x1c3   :  { %v852_v37 = vpop.f32.mrf.mxu0  ;;  %v864_v38 = vpop.f32.mrf.mxu1 }
 0x1c4   :  { %v616_v43 = vmax.f32 %v538_v36, 0.0  ;;  %v553_v44 = vadd.f32 %v852_v37, %v360_v15  ;;  %v729_v52 = vmul.f32 %v656_v18, %v617_v42  ;;  %v737_v37 = vmul.f32 %v696_v39, %v625_v32 }
 0x1c5   :  { %v547_v46 = vpop.f32.mrf.mxu0  ;;  %v587_v50 = vpop.f32.mrf.mxu1 }
 0x1c6   :  { %v728_v47 = vmul.f32 %v651_v17, %v616_v43  ;;  %v548_v48 = vadd.f32 %v547_v46, %v355_v14  ;;  %v619_v49 = vmax.f32 %v553_v44, 0.0  ;;  %v624_v17 = vmax.f32 %v578_v4, 0.0 }
 0x1c7   :  { %v855_v5 = vpop.f32.mrf.mxu0  ;;  %v867_v7 = vpop.f32.mrf.mxu1  ;;  %v588_v18 = vadd.f32 %v587_v50, %v395_v28 }
 0x1c8   :  { %v618_v53 = vmax.f32 %v548_v48, 0.0  ;;  %v563_v54 = vadd.f32 %v855_v5, %v370_v16  ;;  %v744_v60 = vadd.f32 %v729_v52, %v728_v47  ;;  %v731_v6 = vmul.f32 %v666_v20, %v619_v49 }
 0x1c9   :  { %v557_v58 = vpop.f32.mrf.mxu0  ;;  %v597_v13 = vpop.f32.mrf.mxu1  ;;  %v736_v34 = vmul.f32 %v691_v29, %v624_v17  ;;  %v603_v43 = vadd.f32 %v867_v7, %v410_v11 }
 0x1ca   :  { %v730_v1 = vmul.f32 %v661_v19, %v618_v53  ;;  %v558_v3 = vadd.f32 %v557_v58, %v365_v61  ;;  %v621_v40 = vmax.f32 %v563_v54, 0.0  ;;  %v706_v61 = vpop.permute.xlu0 %705  ;;  %v598_v36 = vadd.f32 %v597_v13, %v405_v56 }
 0x1cb   :  { %v858_v45 = vpop.f32.mrf.mxu0  ;;  %v870_v30 = vpop.f32.mrf.mxu1 }
 0x1cc   :  { %v745_v63 = vadd.f32 %v744_v60, %v730_v1  ;;  %v620_v55 = vmax.f32 %v558_v3, 0.0  ;;  %v573_v0 = vadd.f32 %v858_v45, %v380_v22  ;;  %v733_v51 = vmul.f32 %v676_v23, %v621_v40 }
 0x1cd   :  { %v567_v2 = vpop.f32.mrf.mxu0  ;;  %v593_v22 = vadd.f32 %v864_v38, %v400_v35  ;;  %v607_v23 = vpop.f32.mrf.mxu1  ;;  %v628_v28 = vmax.f32 %v598_v36, 0.0  ;;  %v629_v35 = vmax.f32 %v603_v43, 0.0 }
 0x1ce   :  { %v732_v8 = vmul.f32 %v671_v41, %v620_v55  ;;  %v746_v9 = vadd.f32 %v745_v63, %v731_v6  ;;  %v568_v10 = vadd.f32 %v567_v2, %v375_v21  ;;  %v623_v15 = vmax.f32 %v573_v0, 0.0  ;;  %v415_v41 = vpop.permute.xlu1 %414  ;;  %v711_v31 = vpop.permute.xlu0 %710 }
 0x1cf   :  { %v626_v21 = vmax.f32 %v588_v18, 0.0  ;;  %v627_v42 = vmax.f32 %v593_v22, 0.0  ;;  %v608_v47 = vadd.f32 %v607_v23, %v415_v41  ;;  %v740_v29 = vmul.f32 %v711_v31, %v628_v28 }
 0x1d0   :  { %v747_v14 = vadd.f32 %v746_v9, %v732_v8  ;;  %v622_v16 = vmax.f32 %v568_v10, 0.0  ;;  %v735_v33 = vmul.f32 %v686_v27, %v623_v15 }
 0x1d1   :  { %v738_v46 = vmul.f32 %v701_v59, %v626_v21  ;;  %v739_v49 = vmul.f32 %v706_v61, %v627_v42  ;;  %v630_v5 = vmax.f32 %v608_v47, 0.0 }
 0x1d2   :  { %v734_v19 = vmul.f32 %v681_v25, %v622_v16  ;;  %v748_v20 = vadd.f32 %v747_v14, %v733_v51  ;;  %v420_v48 = vpop.permute.xlu1 %419  ;;  %v716_v50 = vpop.permute.xlu0 %715 }
 0x1d3   :  { %v613_v27 = vadd.f32 %v870_v30, %v420_v48  ;;  %v741_v53 = vmul.f32 %v716_v50, %v629_v35 }
 0x1d4   :  { %v749_v24 = vadd.f32 %v748_v20, %v734_v19 }
 0x1d5   :  { %v631_v54 = vmax.f32 %v613_v27, 0.0 }
 0x1d6   :  { %v750_v26 = vadd.f32 %v749_v24, %v735_v33  ;;  %v721_v39 = vpop.permute.xlu1 %720  ;;  %v726_v1 = vpop.permute.xlu0 %725 }
 0x1d7   :  { %v742_v58 = vmul.f32 %v721_v39, %v630_v5  ;;  %v743_v59 = vmul.f32 %v726_v1, %v631_v54 }
 0x1d8   :  { %v751_v44 = vadd.f32 %v750_v26, %v736_v34 }
 0x1da   :  { %v752_v25 = vadd.f32 %v751_v44, %v737_v37  ;;  %v769_v55 = vpop.permute.xlu1 %768 }
 0x1db   :  { %v774_v2 = vrot.slane %v769_v55, %v80_v62 }
 0x1dc   :  { %v753_v38 = vadd.f32 %v752_v25, %v738_v46 }
 0x1de   :  { %v754_v52 = vadd.f32 %v753_v38, %v739_v49 }
 0x1e0   :  { %v755_v56 = vadd.f32 %v754_v52, %v740_v29 }
 0x1e2   :  { %v756_v60 = vadd.f32 %v755_v56, %v741_v53 }
 0x1e4   :  { %v757_v3 = vadd.f32 %v756_v60, %v742_v58 }
 0x1e6   :  { %v758_v6 = vadd.f32 %v757_v3, %v743_v59 }
 0x1e8   :  { %v759_v7 = vrot.slane %v758_v6, 4 }
 0x1ea   :  { %v760_v45 = vadd.f32 %v759_v7, %v758_v6 }
 0x1ec   :  { %v761_v63 = vrot.slane %v760_v45, 2 }
 0x1ee   :  { %v762_v40 = vadd.f32 %v761_v63, %v760_v45 }
 0x1f0   :  { %v763_v0 = vrot.slane %v762_v40, 1 }
 0x1f2   :  { %v764_v4 = vadd.f32 %v763_v0, %v762_v40 }
 0x1f4   :  { %v775_v8 = vadd.f32 %v774_v2, %v764_v4 }
 0x1f6   :  { %776 = vst [vmem:[#allocation3] sm:$0x1] %v775_v8 }
 0x1f7   :  { %930 = shalt.err (!%p927_p4)
}
 0x1f8   :  { %786 = dma.vmem_to_hbm [thread:$0]  %s784_s25, 16, %s1323_s7, [#allocation4]  }
 0x1f9   :  { %939 = dma.done.wait [#allocation4], 16  }
 0x1fa   :  { %940 = vsyncadd [#allocation4], 4294967280 }
 0x1fb   :  { %790 = vsyncpa [#allocation4], 1 }

</bundles_post_ra>
